<compile_context>
chip_gen: v7x
topology: tpu7x:2x2x1
jax: 0.10.0
libtpu: 0.0.40
codegen_flags: <defaults>
</compile_context>

<pallas_src>
import numpy as np
import jax
import jax.numpy as jnp
from jax.experimental import pallas as pl
from jax.experimental.pallas import tpu as pltpu


# ----------------------------- Pallas kernel ------------------------------

def conv_glu_kernel(x_ref, w_ref, b_ref, o_ref):
    """Fused conv(matmul) + bias + dual GLU + sigmoid gating.

    x_ref: (1, KKCin, T)   im2col input tile (spatial on the 128-lane axis)
    w_ref: (Cout2, KKCin)  both branches' conv weights stacked on channels
    b_ref: (Cout2, 1)      both branches' bias
    o_ref: (1, Cg, T)      gated output (pre-pixel-shuffle), Cg = Cout2 // 4
    """
    cout2 = w_ref.shape[0]
    cout = cout2 // 2          # channels per branch
    cg = cout // 2             # channels per branch after GLU

    # Single MXU matmul over the full K*K*Cin contraction, f32 accumulation.
    y = jnp.dot(w_ref[...], x_ref[0], preferred_element_type=jnp.float32)
    y = y + b_ref[...]                                   # (Cout2, T)

    # Branch 1 / branch 2 GLU (channel splits are sublane-tile aligned),
    # then the final sigmoid gate.  The sigmoids run on the EUP slot and are
    # effectively free under the matmul.
    a1, g1 = y[:cg], y[cg:cout]
    a2, g2 = y[cout:cout + cg], y[cout + cg:]
    h1 = a1 * jax.nn.sigmoid(g1)
    h2 = a2 * jax.nn.sigmoid(g2)
    o_ref[...] = (h1 * jax.nn.sigmoid(h2))[None].astype(o_ref.dtype)


# ------------------------------- JAX glue ---------------------------------

def _dilate_and_pad_nchw(x, stride, pad_eff):
    N, C, H, W = x.shape
    if stride > 1:
        Hd, Wd = (H - 1) * stride + 1, (W - 1) * stride + 1
        xd = jnp.zeros((N, C, Hd, Wd), x.dtype)
        xd = xd.at[:, :, ::stride, ::stride].set(x)
    else:
        xd = x
    return jnp.pad(xd, ((0, 0), (0, 0), (pad_eff, pad_eff), (pad_eff, pad_eff)))


def _pixel_shuffle_nchw(x, r):
    N, C, H, W = x.shape
    Co = C // (r * r)
    x = x.reshape(N, Co, r, r, H, W)
    x = jnp.transpose(x, (0, 1, 4, 2, 5, 3))
    return x.reshape(N, Co, H * r, W * r)


def _to_conv_weight(w_t):
    # torch ConvTranspose2d weight (Cin, Cout, K, K) -> correlation weight
    # (K, K, Cin, Cout), spatially flipped.
    return jnp.transpose(w_t[:, :, ::-1, ::-1], (2, 3, 0, 1))


def _pick_lane_tile(P):
    # Whole spatial extent if it is small; otherwise split into lane-dense
    # (multiple-of-128) tiles so double-buffered blocks fit VMEM on v7x too.
    if P <= 2048:
        return P
    for t in (2048, 1024, 512, 256, 128):
        if P % t == 0:
            return t
    return P


def upsample_block_forward(x_nchw, w1, b1, w2, b2, kernel_size, stride, padding):
    K = kernel_size
    x_nchw = x_nchw.astype(jnp.float32)
    N, Cin, H, W = x_nchw.shape
    Cout = w1.shape[1]
    assert Cout % 8 == 0, "dim_out must be divisible by 8 (PixelShuffle(2)+GLU)"
    Cout2 = 2 * Cout
    Cg = Cout // 2           # per-branch channels after GLU (pre pixel-shuffle)
    KKC = K * K * Cin

    # Weight/bias prep: both branches stacked on the output-channel axis,
    # contraction axis flattened as (kh, kw, cin) to match the im2col layout.
    wc = jnp.concatenate([_to_conv_weight(w1), _to_conv_weight(w2)], axis=-1)
    w2d = jnp.transpose(wc.reshape(KKC, Cout2))          # (Cout2, KKCin)
    b2d = jnp.concatenate([b1, b2])[:, None]             # (Cout2, 1)

    # Transposed conv -> correlation on a dilated + padded input.
    pad_eff = K - 1 - padding
    xp = _dilate_and_pad_nchw(x_nchw, stride, pad_eff)   # (N, Cin, Hp, Wp)
    Hp, Wp = xp.shape[2], xp.shape[3]
    Ho, Wo = Hp - K + 1, Wp - K + 1
    P = Ho * Wo

    # im2col (glue): spatial flattened on the fast/lane axis.
    patches = [xp[:, :, kh:kh + Ho, kw:kw + Wo]
               for kh in range(K) for kw in range(K)]     # each (N, Cin, Ho, Wo)
    xcol = jnp.stack(patches, axis=1).reshape(N, KKC, P)  # (N, KKCin, Ho*Wo)

    tl = _pick_lane_tile(P)
    grid = (N, P // tl)

    out_flat = pl.pallas_call(
        conv_glu_kernel,
        out_shape=jax.ShapeDtypeStruct((N, Cg, P), jnp.float32),
        grid=grid,
        in_specs=[
            pl.BlockSpec((1, KKC, tl), lambda n, j: (n, 0, j)),
            pl.BlockSpec((Cout2, KKC), lambda n, j: (0, 0)),
            pl.BlockSpec((Cout2, 1), lambda n, j: (0, 0)),
        ],
        out_specs=pl.BlockSpec((1, Cg, tl), lambda n, j: (n, 0, j)),
        compiler_params=pltpu.CompilerParams(
            dimension_semantics=("parallel", "parallel")),
    )(xcol, w2d, b2d)

    # PixelShuffle of the already-gated (small) result; output is NCHW already.
    out = out_flat.reshape(N, Cg, Ho, Wo)
    return _pixel_shuffle_nchw(out, 2)


# --------------------------- NumPy reference -------------------------------

def _ref_conv_transpose(x, w, b, stride, padding):
    N, Cin, H, Wd = x.shape
    _, Cout, K, _ = w.shape
    Ho = (H - 1) * stride - 2 * padding + K
    Wo = (Wd - 1) * stride - 2 * padding + K
    y = np.zeros((N, Cout, Ho + 2 * padding, Wo + 2 * padding), dtype=np.float64)
    for ih in range(H):
        for iw in range(Wd):
            contrib = np.einsum('nc,cokl->nokl', x[:, :, ih, iw], w)
            y[:, :, ih * stride:ih * stride + K, iw * stride:iw * stride + K] += contrib
    y = y[:, :, padding:padding + Ho, padding:padding + Wo]
    if b is not None:
        y = y + b[None, :, None, None]
    return y


def _ref_pixel_shuffle(x, r):
    N, C, H, W = x.shape
    Co = C // (r * r)
    x = x.reshape(N, Co, r, r, H, W)
    x = x.transpose(0, 1, 4, 2, 5, 3)
    return x.reshape(N, Co, H * r, W * r)


def _ref_glu(x, axis=1):
    a, b = np.split(x, 2, axis=axis)
    return a * (1.0 / (1.0 + np.exp(-b)))


def _ref_forward(x, w1, b1, w2, b2, stride, padding):
    y1 = _ref_glu(_ref_pixel_shuffle(_ref_conv_transpose(x, w1, b1, stride, padding), 2))
    y2 = _ref_glu(_ref_pixel_shuffle(_ref_conv_transpose(x, w2, b2, stride, padding), 2))
    return y1 * (1.0 / (1.0 + np.exp(-y2)))


# --------------------------------- main ------------------------------------

if __name__ == "__main__":
    # Module config (dim_out must be divisible by 8 for PixelShuffle(2) + GLU)
    dim_in, dim_out = 4, 16
    kernel_size, stride, padding, use_bias = 3, 1, 1, True

    N, H, W = 2, 16, 16

    key = jax.random.PRNGKey(0)
    kx, kw1, kb1, kw2, kb2 = jax.random.split(key, 5)

    x = jax.random.normal(kx, (N, dim_in, H, W), jnp.float32)
    # torch ConvTranspose2d weight layout: (Cin, Cout, K, K)
    w1 = jax.random.normal(kw1, (dim_in, dim_out, kernel_size, kernel_size), jnp.float32) * 0.1
    w2 = jax.random.normal(kw2, (dim_in, dim_out, kernel_size, kernel_size), jnp.float32) * 0.1
    b1 = (jax.random.normal(kb1, (dim_out,), jnp.float32) * 0.1) if use_bias else jnp.zeros((dim_out,), jnp.float32)
    b2 = (jax.random.normal(kb2, (dim_out,), jnp.float32) * 0.1) if use_bias else jnp.zeros((dim_out,), jnp.float32)

    out = upsample_block_forward(x, w1, b1, w2, b2, kernel_size, stride, padding)
    out = jax.block_until_ready(out)

    ref = _ref_forward(np.asarray(x, np.float64), np.asarray(w1, np.float64),
                       np.asarray(b1, np.float64), np.asarray(w2, np.float64),
                       np.asarray(b2, np.float64), stride, padding)

    assert out.shape == ref.shape, (out.shape, ref.shape)
    np.testing.assert_allclose(np.asarray(out, np.float64), ref, rtol=1e-4, atol=1e-4)

    print("KERNEL_OK")
</pallas_src>

<mosaic_0001>
module attributes {stable_mosaic.version = 11 : i64} {
  func.func @conv_glu_kernel(%arg0: i32, %arg1: i32, %arg2: memref<1x36x256xf32, #tpu.memory_space<vmem>>, %arg3: memref<32x36xf32, #tpu.memory_space<vmem>>, %arg4: memref<32x1xf32, #tpu.memory_space<vmem>>, %arg5: memref<1x8x256xf32, #tpu.memory_space<vmem>>) attributes {dimension_semantics = [#tpu.dimension_semantics<parallel>, #tpu.dimension_semantics<parallel>], iteration_bounds = array<i64: 2, 1>, scalar_prefetch = 0 : i64, scratch_operands = 0 : i64, tpu.core_type = #tpu.core_type<tc>, window_params = [{transform_indices = @transform_0, window_bounds = array<i64: 1, 36, 256>}, {pipeline_mode = #tpu.pipeline_mode<synchronous>, transform_indices = @transform_1, window_bounds = array<i64: 32, 36>}, {pipeline_mode = #tpu.pipeline_mode<synchronous>, transform_indices = @transform_2, window_bounds = array<i64: 32, 1>}, {transform_indices = @transform_3, window_bounds = array<i64: 1, 8, 256>}]} {
    %c0 = arith.constant 0 : index
    %c0_0 = arith.constant 0 : index
    %0 = vector.load %arg3[%c0, %c0_0] : memref<32x36xf32, #tpu.memory_space<vmem>>, vector<32x36xf32>
    %c0_1 = arith.constant 0 : index
    %c0_2 = arith.constant 0 : index
    %c0_3 = arith.constant 0 : index
    %1 = vector.load %arg2[%c0_1, %c0_2, %c0_3] : memref<1x36x256xf32, #tpu.memory_space<vmem>>, vector<1x36x256xf32>
    %2 = vector.shape_cast %1 : vector<1x36x256xf32> to vector<36x256xf32>
    %cst = arith.constant dense<0.000000e+00> : vector<32x256xf32>
    %3 = tpu.matmul %0, %2, %cst {dimension_numbers = #tpu.dot_dimension_numbers<[1], [0], [0], [1], [0, 0, 1, 1], [], []>} : vector<32x36xf32>, vector<36x256xf32>, vector<32x256xf32> -> vector<32x256xf32>
    %c0_4 = arith.constant 0 : index
    %c0_5 = arith.constant 0 : index
    %4 = vector.load %arg4[%c0_4, %c0_5] : memref<32x1xf32, #tpu.memory_space<vmem>>, vector<32x1xf32>
    %5 = vector.broadcast %4 : vector<32x1xf32> to vector<32x256xf32>
    %6 = arith.addf %3, %5 : vector<32x256xf32>
    %7 = vector.extract_strided_slice %6 {offsets = [0, 0], sizes = [8, 256], strides = [1, 1]} : vector<32x256xf32> to vector<8x256xf32>
    %8 = vector.extract_strided_slice %6 {offsets = [8, 0], sizes = [8, 256], strides = [1, 1]} : vector<32x256xf32> to vector<8x256xf32>
    %9 = vector.extract_strided_slice %6 {offsets = [16, 0], sizes = [8, 256], strides = [1, 1]} : vector<32x256xf32> to vector<8x256xf32>
    %10 = vector.extract_strided_slice %6 {offsets = [24, 0], sizes = [8, 256], strides = [1, 1]} : vector<32x256xf32> to vector<8x256xf32>
    %11 = arith.negf %8 : vector<8x256xf32>
    %12 = math.exp %11 : vector<8x256xf32>
    %cst_6 = arith.constant 1.000000e+00 : f32
    %13 = vector.broadcast %cst_6 : f32 to vector<8x256xf32>
    %14 = arith.addf %13, %12 : vector<8x256xf32>
    %15 = arith.divf %13, %14 : vector<8x256xf32>
    %16 = arith.mulf %7, %15 : vector<8x256xf32>
    %17 = arith.negf %10 : vector<8x256xf32>
    %18 = math.exp %17 : vector<8x256xf32>
    %cst_7 = arith.constant 1.000000e+00 : f32
    %19 = vector.broadcast %cst_7 : f32 to vector<8x256xf32>
    %20 = arith.addf %19, %18 : vector<8x256xf32>
    %21 = arith.divf %19, %20 : vector<8x256xf32>
    %22 = arith.mulf %9, %21 : vector<8x256xf32>
    %23 = arith.negf %22 : vector<8x256xf32>
    %24 = math.exp %23 : vector<8x256xf32>
    %cst_8 = arith.constant 1.000000e+00 : f32
    %25 = vector.broadcast %cst_8 : f32 to vector<8x256xf32>
    %26 = arith.addf %25, %24 : vector<8x256xf32>
    %27 = arith.divf %25, %26 : vector<8x256xf32>
    %28 = arith.mulf %16, %27 : vector<8x256xf32>
    %29 = vector.shape_cast %28 : vector<8x256xf32> to vector<1x8x256xf32>
    %c0_9 = arith.constant 0 : index
    %c0_10 = arith.constant 0 : index
    %c0_11 = arith.constant 0 : index
    %30 = vector.load %arg5[%c0_9, %c0_10, %c0_11] : memref<1x8x256xf32, #tpu.memory_space<vmem>>, vector<1x8x256xf32>
    tpu.vector_store %arg5[%c0_9, %c0_10, %c0_11], %29 {strides = array<i32>} : memref<1x8x256xf32, #tpu.memory_space<vmem>>, vector<1x8x256xf32>,
    return
  }
  func.func @transform_0(%arg0: i32, %arg1: i32) -> (i32, i32, i32) {
    %c0_i32 = arith.constant 0 : i32
    %c0_i32_0 = arith.constant 0 : i32
    return %arg0, %c0_i32, %arg1 : i32, i32, i32
  }
  func.func @transform_1(%arg0: i32, %arg1: i32) -> (i32, i32) {
    %c0_i32 = arith.constant 0 : i32
    %c0_i32_0 = arith.constant 0 : i32
    %c0_i32_1 = arith.constant 0 : i32
    return %c0_i32, %c0_i32_0 : i32, i32
  }
  func.func @transform_2(%arg0: i32, %arg1: i32) -> (i32, i32) {
    %c0_i32 = arith.constant 0 : i32
    %c0_i32_0 = arith.constant 0 : i32
    %c0_i32_1 = arith.constant 0 : i32
    return %c0_i32, %c0_i32_0 : i32, i32
  }
  func.func @transform_3(%arg0: i32, %arg1: i32) -> (i32, i32, i32) {
    %c0_i32 = arith.constant 0 : i32
    %c0_i32_0 = arith.constant 0 : i32
    return %arg0, %c0_i32, %arg1 : i32, i32, i32
  }
}

</mosaic_0001>

<bundles_post_ra>
// kernel: tpu_custom_call.1
= control target key start
LH: loop header
LB: loop body
LE: loop exit
PB: predicated region body
PF: predicated region fallthrough
CT: control target
= control target key end

     0   :  { %8 = vsyncpa [#allocation3], 0  ;;  %s846_s0 = inlined_call_operand.vmem [shape: f32[2,36,256], index: 0, kind: input, shape index: {}]   ;;  %s847_s1 = inlined_call_operand.vmem [shape: f32[32,36], index: 1, kind: input, shape index: {}]   ;;  %s848_s2 = inlined_call_operand.vmem [shape: f32[32,1], index: 2, kind: input, shape index: {}]   ;;  %s849_s3 = inlined_call_operand.hbm [shape: f32[2,8,256], index: 3, kind: output, shape index: {}]  }
   0x1   :  { %10 = vsyncpa [#allocation3 + $0x1], 0  ;;  %s710_s12 = smov 0   ;;  %s712_s13 = smov 0  }
   0x2   :  { %s714_s14 = smov 0   ;;  %s716_s15 = smov 0  }
   0x3   :  { %s718_s16 = smov 0   ;;  %s720_s17 = smov 0  }
   0x4 LB: > { %s484_s18 = sadd.s32 4294967295, %s685_s17   ;;  %s485_s19 = sadd.s32 4294967294, %s685_s17   ;;  %s685_s17 = sphi %s720_s17, %s16_s17   ;;  %s681_s16 = sphi %s718_s16, %s856_s16   ;;  %s677_s15 = sphi %s716_s15, %s855_s15   ;;  %s673_s14 = sphi %s714_s14, %s854_s14   ;;  %s669_s13 = sphi %s712_s13, %s853_s13   ;;  %s665_s12 = sphi %s710_s12, %s852_s12  }
   0x5   : > { %s28_s20 = sadd.s32 1, %s681_s16  ;;  %s107_s21 = sadd.s32 1, %s673_s14 }
   0x6   : > { %p30_p0 = scmp.ge.s32.totalorder %s28_s20, 2  ;;  %p117_p1 = scmp.ne.s32.totalorder %s673_s14, %s669_s13 }
   0x7   : > { %p118_p2 = scmp.eq.s32.totalorder %s484_s18, 1  ;;  %p123_p3 = scmp.ne.s32.totalorder %s669_s13, %s665_s12 }
   0x8   : > { %s858_s20 = smov (%p30_p0, %s28_s20), 0  ;;  %p124_p5 = scmp.eq.s32.totalorder %s485_s19, 1 }
   0x9   : > { %p750_p4 = por %p118_p2, %p117_p1  ;;  %s102_s23 = ssub.s32 %s681_s16, %s858_s20 }
   0xa   : > { %p488_p6 = scmp.ge.s32.totalorder %s685_s17, 1  ;;  %p105_p7 = scmp.eq.s32.totalorder %s102_s23, 0 }
   0xb   : > { %p757_p8 = por %p124_p5, %p123_p3  ;;  %p161_p9 = scmp.lt.s32.totalorder %s685_s17, 3 }
   0xc   : > { %s763_s25 = scalar_select %p105_p7, %s673_s14, %s107_s21  }
   0xd   : > { %p162_p10 = pnand %p488_p6, %p161_p9 }
   0xe   : > { %p190_p11 = scmp.lt.s32.totalorder (!%p162_p10), %s677_s15, 1  ;;  %v687_v0 = vmov (!%p162_p10), 0.0   ;;  %v217_v1 = vld [vmem:[%s848_s2 + $0x18] sm:$0xff] (!%p162_p10)  ;;  %v688_v2 = vmov (!%p162_p10), 0   ;;  %v216_v3 = vld [vmem:[%s848_s2 + $0x10] sm:$0xff] (!%p162_p10)  ;;  %v215_v4 = vld [vmem:[%s848_s2 + $0x8] sm:$0xff] (!%p162_p10) }
   0xf   : > { %165 = sbr.rel (%p162_p10) target bundleno = 331 (0x14b), region = 32  ;;  %322 = vmatprep.mubr.f32.mxu0 (!%p162_p10), %v687_v0  ;;  %334 = vmatprep.mubr.f32.mxu1 (!%p162_p10), %v687_v0  ;;  %v214_v5 = vld [vmem:[%s848_s2] sm:$0xff] (!%p162_p10)  ;;  %vm251_vm0 = vcmask (!%p162_p10), 1043456   ;;  %vm238_vm1 = vcmask (!%p162_p10), 293888   ;;  %v202_v21 = vld [vmem:[%s847_s1 + $0x10] sm:$0xff] (!%p162_p10)  ;;  %v201_v22 = vld [vmem:[%s847_s1 + $0x8] sm:$0xff] (!%p162_p10) }
  0x10   : > { %582 = vset.pattern.permute.xlu1 (!%p162_p10), %v688_v2  ;;  %581 = vset.pattern.permute.xlu0 (!%p162_p10), %v688_v2  ;;  %v200_v20 = vld [vmem:[%s847_s1] sm:$0xff] (!%p162_p10)  ;;  %v203_v23 = vld [vmem:[%s847_s1 + $0x18] sm:$0xff] (!%p162_p10)  ;;  %s186_s30 = sand.u32 (!%p162_p10), 1, %s669_s13   ;;  %s508_s5 = sshll.u32 (!%p162_p10), %s677_s15, 8 }
  0x11   : > { %235 = vperm.xlu0 (!%p162_p10), %581, %v217_v1   ;;  %230 = vperm.xlu1 (!%p162_p10), %582, %v216_v3   ;;  %s799_s10 = scalar_lea.hbm (!%p162_p10), %s849_s3, %s508_s5 }
  0x15   : > { %225 = vperm.xlu0 (!%p162_p10), %581, %v215_v4   ;;  %220 = vperm.xlu1 (!%p162_p10), %582, %v214_v5  }
  0x16   : > { %s191_s28 = scalar_select %p190_p11, %s677_s15, 1 }
  0x17   : > { %s689_s15 = smov [#allocation2]  }
  0x18   : > { %s523_s4 = smul.u32 80, %s191_s28  ;;  %s611_s19 = sshll.u32 %s689_s15, 4  ;;  %s612_s19 = int_to_ptr.vmem [resolvable:$false] %s611_s19 }
  0x19   : > { %s613_s21 = scalar_lea.vmem %s612_s19, 512 }
  0x1a   : > { %s197_s11 = scalar_lea.vmem %s846_s0, %s523_s4  ;;  %s489_s4 = sshll.u32 %s186_s30, 4 }
  0x1b   : > { %v205_v6 = vld [vmem:[%s197_s11 + $0x8] sm:$0xff]  ;;  %v207_v7 = vld [vmem:[%s197_s11 + $0x18] sm:$0xff]  ;;  %v204_v8 = vld [vmem:[%s197_s11] sm:$0xff]  ;;  %s188_s6 = scalar_lea.vmem [#allocation2], %s489_s4 }
  0x1c   : > { %v509_v9 = vpack.c.bf16 %v207_v7, %v205_v6  ;;  %v206_v10 = vld [vmem:[%s197_s11 + $0x10] sm:$0xff]  ;;  %v209_v11 = vld [vmem:[%s197_s11 + $0x28] sm:$0xff]  ;;  %v211_v12 = vld [vmem:[%s197_s11 + $0x38] sm:$0xff]  ;;  %s408_s7 = sshll.u32 %s188_s6, 4  ;;  %s801_s7 = int_to_ptr.vmem [resolvable:$true] %s408_s7 }
  0x1d   : > { %v511_v13 = vpack.c.bf16 %v206_v10, %v204_v8  ;;  %v513_v14 = vpack.c.bf16 %v211_v12, %v209_v11  ;;  %v208_v15 = vld [vmem:[%s197_s11 + $0x20] sm:$0xff]  ;;  %v210_v16 = vld [vmem:[%s197_s11 + $0x30] sm:$0xff]  ;;  %v213_v18 = vld [vmem:[%s197_s11 + $0x48] sm:$0xf]  ;;  %s607_s18 = scalar_lea.vmem %s801_s7, 256  ;;  %p614_p1 = scmp.lt.s32.totalorder %s801_s7, %s612_s19 }
  0x1e   : > { %510 = vmatprep.subr.bf16.mxu0 %v509_v9  ;;  %517 = vmatprep.subr.bf16.mxu1 %v509_v9  ;;  %v515_v17 = vpack.c.bf16 %v210_v16, %v208_v15  ;;  %v212_v19 = vld [vmem:[%s197_s11 + $0x40] sm:$0xf]  ;;  %s392_s11 = scalar_lea.sflag [#allocation3], %s186_s30  ;;  %p608_p12 = scmp.ne.s32.totalorder %s801_s7, %s607_s18 }
  0x1f   : > { %512 = vmatpush1.bf16.msra.mxu0 %v511_v13  ;;  %520 = vmatpush1.bf16.msra.mxu1 %v511_v13  ;;  %p615_p2 = scmp.lt.s32.totalorder %s613_s21, %s607_s18 }
  0x20   : > { %514 = vmatprep.subr.bf16.mxu0 %v513_v14  ;;  %518 = vmatprep.subr.bf16.mxu1 %v513_v14  ;;  %p609_p13 = pnand %p608_p12, %p750_p4 }
  0x21   : > { %p616_p3 = por %p615_p2, %p614_p1 }
  0x22   : > { %p610_p0 = pneg %p609_p13 }
  0x23   : > { %516 = vmatpush1.bf16.msra.mxu0 %v515_v17  ;;  %521 = vmatpush1.bf16.msra.mxu1 %v515_v17 }
  0x24   : > { %491 = vmatprep.subr.msk.mxu0 %vm251_vm0, %v213_v18  ;;  %519 = vmatprep.subr.msk.mxu1 %vm251_vm0, %v213_v18  ;;  %p617_p5 = pnand %p616_p3, %p610_p0 }
  0x27   : > { %492 = vmatpush1.msk.msra.mxu0 %vm251_vm0, %v212_v19  ;;  %522 = vmatpush1.msk.msra.mxu1 %vm251_vm0, %v212_v19 }
  0x28   : > { %493 = vmatmul.mubr.msk.f32.vlgmr.msra.gmra.mrb[0].mxu0 %vm238_vm1, %v200_v20  ;;  %495 = vmatmul.mubr.msk.f32.vlgmr.msra.gmra.mrb[0].mxu1 %vm238_vm1, %v202_v21 }
  0x29   : > { %328 = vmatprep.mubr.f32.mxu0 %v687_v0  ;;  %340 = vmatprep.mubr.f32.mxu1 %v687_v0 }
  0x2c   : > { %494 = vmatmul.mubr.msk.f32.gmra.mrb[2].mxu0 %vm238_vm1, %v201_v22  ;;  %496 = vmatmul.mubr.msk.f32.gmra.mrb[2].mxu1 %vm238_vm1, %v203_v23 }
  0x90   : > { %v236_v24 = vpop.permute.xlu0 %235  ;;  %v231_v50 = vpop.permute.xlu1 %230 }
  0x94   : > { %v226_v29 = vpop.permute.xlu0 %225  ;;  %v221_v51 = vpop.permute.xlu1 %220 }
  0xfb   : > { %v336_v25 = vpop.f32.mrb[0].mxu1  ;;  %v324_v26 = vpop.f32.mrb[0].mxu0 }
  0xfc   : > { %v338_v27 = vpop.f32.mrb[1].mxu1  ;;  %v326_v28 = vpop.f32.mrb[1].mxu0  ;;  %v325_v52 = vadd.f32 %v324_v26, %v221_v51  ;;  %v337_v54 = vadd.f32 %v336_v25, %v231_v50 }
  0xfd   : > { %v327_v56 = vadd.f32 %v326_v28, %v221_v51  ;;  %v339_v59 = vadd.f32 %v338_v27, %v231_v50 }
  0xff   : > { %v330_v30 = vpop.f32.mrb[2].mxu0  ;;  %v342_v31 = vpop.f32.mrb[2].mxu1 }
 0x100   : > { %v331_v32 = vadd.f32 %v330_v30, %v226_v29  ;;  %v343_v33 = vadd.f32 %v342_v31, %v236_v24  ;;  %v332_v34 = vpop.f32.mrb[3].mxu0  ;;  %v344_v35 = vpop.f32.mrb[3].mxu1 }
 0x101   : > { %v333_v36 = vadd.f32 %v332_v34, %v226_v29  ;;  %v345_v37 = vadd.f32 %v344_v35, %v236_v24 }
 0x102   : > { %v497_v38 = vmul.f32 -1.442695, %v331_v32  ;;  %v499_v39 = vmul.f32 -1.442695, %v343_v33 }
 0x103   : > { %v498_v40 = vmul.f32 -1.442695, %v333_v36  ;;  %v500_v41 = vmul.f32 -1.442695, %v345_v37 }
 0x104   : > { %583 = vpow2.f32 %v497_v38 }
 0x105   : > { %585 = vpow2.f32 %v499_v39 }
 0x106   : > { %587 = vpow2.f32 %v498_v40 }
 0x107   : > { %589 = vpow2.f32 %v500_v41 }
 0x10e   : > { %v584_v42 = vpop.eup %583 }
 0x10f   : > { %v586_v43 = vpop.eup %585  ;;  %v353_v44 = vadd.f32 1.0, %v584_v42 }
 0x110   : > { %v588_v45 = vpop.eup %587  ;;  %v367_v46 = vadd.f32 1.0, %v586_v43 }
 0x111   : > { %v590_v47 = vpop.eup %589  ;;  %591 = vrcp.f32 %v353_v44  ;;  %v354_v48 = vadd.f32 1.0, %v588_v45 }
 0x112   : > { %593 = vrcp.f32 %v367_v46  ;;  %v368_v49 = vadd.f32 1.0, %v590_v47 }
 0x113   : > { %595 = vrcp.f32 %v354_v48 }
 0x114   : > { %597 = vrcp.f32 %v368_v49 }
 0x11b   : > { %v592_v53 = vpop.eup %591 }
 0x11c   : > { %v594_v55 = vpop.eup %593  ;;  %v359_v57 = vmul.f32 %v592_v53, %v325_v52 }
 0x11d   : > { %v596_v58 = vpop.eup %595  ;;  %v373_v60 = vmul.f32 %v594_v55, %v337_v54 }
 0x11e   : > { %v598_v61 = vpop.eup %597  ;;  %v360_v62 = vmul.f32 %v596_v58, %v327_v56 }
 0x11f   : > { %v501_v63 = vmul.f32 -1.442695, %v373_v60  ;;  %v374_v0 = vmul.f32 %v598_v61, %v339_v59 }
 0x121   : > { %599 = vpow2.f32 %v501_v63  ;;  %v502_v1 = vmul.f32 -1.442695, %v374_v0 }
 0x123   : > { %601 = vpow2.f32 %v502_v1 }
 0x12b   : > { %v600_v2 = vpop.eup %599 }
 0x12c   : > { %v381_v3 = vadd.f32 1.0, %v600_v2 }
 0x12d   : > { %v602_v4 = vpop.eup %601 }
 0x12e   : > { %v382_v5 = vadd.f32 1.0, %v602_v4  ;;  %603 = vrcp.f32 %v381_v3 }
 0x130   : > { %605 = vrcp.f32 %v382_v5 }
 0x138   : > { %v604_v6 = vpop.eup %603 }
 0x139   : > { %v387_v7 = vmul.f32 %v604_v6, %v359_v57 }
 0x13a   : > { %v606_v8 = vpop.eup %605 }
 0x13b   : > { %v388_v9 = vmul.f32 %v606_v8, %v360_v62  ;;  %389 = vst [vmem:[%s188_s6] sm:$0xff] %v387_v7 }
 0x13d   : > { %390 = vst [vmem:[%s188_s6 + $0x8] sm:$0xff] %v388_v9 }
 0x13e   : > { %620 = shalt.err (!%p617_p5)
}
 0x13f   : > { %s621_s23 = scalar_lea.hbm %s799_s10, 256  ;;  %s625_s28 = scalar_lea.hbm %s849_s3, 512 }
 0x140   : > { %p622_p6 = scmp.ne.s32.totalorder %s799_s10, %s621_s23  ;;  %p626_p10 = scmp.lt.u32.totalorder %s799_s10, %s849_s3 }
 0x141   : > { %p627_p11 = scmp.lt.u32.totalorder %s625_s28, %s621_s23  ;;  %p629_p13 = scmp.lt.u32.totalorder %s621_s23, %s799_s10 }
 0x142   : > { %p623_p7 = pnand %p622_p6, %p750_p4 }
 0x143   : > { %p628_p12 = por %p627_p11, %p626_p10 }
 0x144   : > { %p624_p9 = pneg %p623_p7 }
 0x145   : > { %p630_p0 = por %p629_p13, %p628_p12 }
 0x147   : > { %p631_p1 = pnand %p630_p0, %p624_p9 }
 0x149   : > { %634 = shalt.err (!%p631_p1)
}
 0x14a   : > { %524 = dma.vmem_to_hbm [thread:$0]  (%p750_p4), %s801_s7, 256, %s799_s10, %s392_s11  }
 0x14b PF: > { %p530_p2 = scmp.ge.s32.totalorder %s685_s17, 2  ;;  %s420_s4 = sand.u32 1, %s665_s12  }
 0x14c   : > { %s421_s5 = scalar_lea.sflag [#allocation3], %s420_s4 }
 0x14d   : > { %p527_p3 = pnand %p530_p2, %p757_p8 }
 0x14f   : > { %660 = dma.done.wait (!%p527_p3), %s421_s5, 256  }
 0x150   : > { %662 = vsyncadd (!%p527_p3), %s421_s5, 4294967040  ;;  %s16_s17 = sadd.s32 1, %s685_s17   ;;  %s852_s12 = smov %s669_s13 }
 0x151   : > { %p13_p5 = scmp.ge.s32.totalorder %s16_s17, 4   ;;  %s853_s13 = smov %s673_s14 }
 0x152   : > { %s854_s14 = smov %s763_s25  ;;  %s855_s15 = smov %s681_s16 }
 0x153   : > { %s856_s16 = smov %s858_s20  ;;  %15 = sbr.rel (!%p13_p5) target bundleno = 4 (0x4), region = 67 }
 0x15a   :  { %426 = vsyncpa [#allocation3], 1 }
 0x15b   :  { %428 = vsyncpa [#allocation3 + $0x1], 1 }

</bundles_post_ra>
